<compile_context>
chip_gen: v5e
topology: v5e:2x2
jax: 0.10.0
libtpu: 0.0.40
codegen_flags: <defaults>
</compile_context>

<pallas_src>
import jax
import jax.numpy as jnp
from jax.experimental import pallas as pl
from jax.experimental.pallas import tpu as pltpu

THRESHOLD_POS = 0.5
THRESHOLD_NEG = -0.5
HID_PAD = 16  # hidden dim (10) padded to the 8-sublane multiple; lives on sublanes


def sacred_pause_kernel(xT_ref, w1T_ref, b1_ref, w2_ref, thr_ref, o_ref):
    # fc1 on the MXU: (HID_PAD, in) @ (in, TB) -> (HID_PAD, TB), f32 accumulation.
    hT = jnp.dot(w1T_ref[...], xT_ref[...],
                 preferred_element_type=jnp.float32)          # (16, TB)
    hT = jnp.maximum(hT + b1_ref[...], 0.0)                   # bias + ReLU (VPU)

    # fc2 on the MXU: (1, HID_PAD) @ (HID_PAD, TB) -> (1, TB); batch on the lane axis.
    score = jnp.dot(w2_ref[...], hT,
                    preferred_element_type=jnp.float32)       # (1, TB)

    # TernaryNeuron with b2 pre-folded into the thresholds (SMEM scalars).
    thr_pos = thr_ref[0]
    thr_neg = thr_ref[1]
    decision = jnp.where(score > thr_pos, 1.0,
                         jnp.where(score < thr_neg, -1.0, 0.0))
    o_ref[...] = decision.astype(o_ref.dtype)                 # lane-dense bf16 store


def sacred_pause_forward(x, w1, b1, w2, b2, *, block_b=2048, x_dtype=jnp.bfloat16):
    B, in_size = x.shape
    hid = w1.shape[1]

    # Large tiles amortize per-step overhead; for small B shrink the tile so the
    # grid still has >= 2 steps (keeps both v7x TensorCores busy).
    if B <= block_b:
        block_b = max(128, pl.cdiv(pl.cdiv(B, 2), 128) * 128)
    B_pad = pl.cdiv(B, block_b) * block_b

    # Pre-transpose / pad weights.  Padded hidden rows of w1T/b1 are zero, so the
    # padded hT rows are exactly 0 after ReLU; padded w2 columns are zero => inert.
    w1Tp = jnp.zeros((HID_PAD, in_size), jnp.float32).at[:hid, :].set(w1.T)
    b1p = jnp.zeros((HID_PAD, 1), jnp.float32).at[:hid, :].set(b1.reshape(hid, 1))
    w2p = jnp.zeros((1, HID_PAD), jnp.float32).at[:, :hid].set(w2.reshape(1, hid))

    # Fold b2 into the thresholds; pass via SMEM (no VMEM buffer / DMA for b2).
    thr = jnp.stack([THRESHOLD_POS - b2.reshape(()),
                     THRESHOLD_NEG - b2.reshape(())]).astype(jnp.float32)

    # Stream x transposed + bf16 (fused cast+transpose in the wrapper).  Padded
    # batch columns give a nonzero score but are sliced away below.
    xTp = jnp.zeros((in_size, B_pad), x_dtype).at[:, :B].set(x.T.astype(x_dtype))
    w1Tp = w1Tp.astype(x_dtype)

    out = pl.pallas_call(
        sacred_pause_kernel,
        out_shape=jax.ShapeDtypeStruct((1, B_pad), jnp.bfloat16),
        grid=(B_pad // block_b,),
        in_specs=[
            pl.BlockSpec((in_size, block_b), lambda i: (0, i)),   # xT tiles (streamed)
            pl.BlockSpec((HID_PAD, in_size), lambda i: (0, 0)),   # w1T (VMEM-resident)
            pl.BlockSpec((HID_PAD, 1), lambda i: (0, 0)),         # b1 column (resident)
            pl.BlockSpec((1, HID_PAD), lambda i: (0, 0)),         # w2 row (resident)
            pl.BlockSpec(memory_space=pltpu.MemorySpace.SMEM),    # thresholds
        ],
        out_specs=pl.BlockSpec((1, block_b), lambda i: (0, i)),   # lane-dense output
        compiler_params=pltpu.CompilerParams(
            dimension_semantics=("parallel",)),
    )(xTp, w1Tp, b1p, w2p, thr)

    return out[0, :B].reshape(B, 1).astype(jnp.float32)


def init_params(key, input_size=3, hidden_size=10):
    # Deterministic init mimicking nn.Linear's U(-1/sqrt(fan_in), 1/sqrt(fan_in)).
    k1, k2, k3, k4 = jax.random.split(key, 4)
    bound1 = 1.0 / jnp.sqrt(float(input_size))
    bound2 = 1.0 / jnp.sqrt(float(hidden_size))
    w1 = jax.random.uniform(k1, (input_size, hidden_size), jnp.float32, -bound1, bound1)
    b1 = jax.random.uniform(k2, (1, hidden_size), jnp.float32, -bound1, bound1)
    w2 = jax.random.uniform(k3, (hidden_size, 1), jnp.float32, -bound2, bound2)
    b2 = jax.random.uniform(k4, (1, 1), jnp.float32, -bound2, bound2)
    return w1, b1, w2, b2


if __name__ == "__main__":
    key = jax.random.PRNGKey(0)
    k_x, k_p = jax.random.split(key)

    # Small demo shapes consistent with the module; batch deliberately not a
    # multiple of the batch tile to exercise the pad/slice path.
    batch, input_size, hidden_size = 200, 3, 10
    # Scale inputs a bit so scores actually cross the +/-0.5 thresholds.
    x = 4.0 * jax.random.normal(k_x, (batch, input_size), jnp.float32)
    w1, b1, w2, b2 = init_params(k_p, input_size, hidden_size)

    out = sacred_pause_forward(x, w1, b1, w2, b2)
    out = jax.block_until_ready(out)

    # Pure-JAX reference mirroring the kernel's bf16 quantization of x / w1
    # (the MXU accumulates in f32).
    xq = x.astype(jnp.bfloat16).astype(jnp.float32)
    w1q = w1.astype(jnp.bfloat16).astype(jnp.float32)
    h_ref = jnp.maximum(xq @ w1q + b1, 0.0)
    score_ref = h_ref @ w2 + b2
    ref = jnp.where(score_ref > THRESHOLD_POS, 1.0,
                    jnp.where(score_ref < THRESHOLD_NEG, -1.0, 0.0))

    assert out.shape == (batch, 1)
    # Ternary outputs are brittle near the thresholds: allow a mismatch only when
    # the reference score is within 1e-3 of a threshold (rounding-order effects).
    mismatch = out != ref
    near_thr = jnp.minimum(jnp.abs(score_ref - THRESHOLD_POS),
                           jnp.abs(score_ref - THRESHOLD_NEG)) < 1e-3
    assert bool(jnp.all(jnp.logical_or(~mismatch, near_thr))), (out, ref)

    print("KERNEL_OK")
</pallas_src>

<mosaic_0001>
module attributes {stable_mosaic.version = 11 : i64} {
  func.func @sacred_pause_kernel(%arg0: i32, %arg1: memref<3x128xbf16, #tpu.memory_space<vmem>>, %arg2: memref<16x3xbf16, #tpu.memory_space<vmem>>, %arg3: memref<16x1xf32, #tpu.memory_space<vmem>>, %arg4: memref<1x16xf32, #tpu.memory_space<vmem>>, %arg5: memref<2xf32, #tpu.memory_space<smem>>, %arg6: memref<1x128xbf16, #tpu.memory_space<vmem>>) attributes {dimension_semantics = [#tpu.dimension_semantics<parallel>], iteration_bounds = array<i64: 2>, scalar_prefetch = 0 : i64, scratch_operands = 0 : i64, tpu.core_type = #tpu.core_type<tc>, window_params = [{transform_indices = @transform_0, window_bounds = array<i64: 3, 128>}, {pipeline_mode = #tpu.pipeline_mode<synchronous>, transform_indices = @transform_1, window_bounds = array<i64: 16, 3>}, {pipeline_mode = #tpu.pipeline_mode<synchronous>, transform_indices = @transform_2, window_bounds = array<i64: 16, 1>}, {pipeline_mode = #tpu.pipeline_mode<synchronous>, transform_indices = @transform_3, window_bounds = array<i64: 1, 16>}, {transform_indices = @transform_4, window_bounds = array<i64: 2>}, {transform_indices = @transform_5, window_bounds = array<i64: 1, 128>}]} {
    %c0 = arith.constant 0 : index
    %c0_0 = arith.constant 0 : index
    %0 = vector.load %arg2[%c0, %c0_0] : memref<16x3xbf16, #tpu.memory_space<vmem>>, vector<16x3xbf16>
    %c0_1 = arith.constant 0 : index
    %c0_2 = arith.constant 0 : index
    %1 = vector.load %arg1[%c0_1, %c0_2] : memref<3x128xbf16, #tpu.memory_space<vmem>>, vector<3x128xbf16>
    %cst = arith.constant dense<0.000000e+00> : vector<16x128xf32>
    %2 = tpu.matmul %0, %1, %cst {dimension_numbers = #tpu.dot_dimension_numbers<[1], [0], [0], [1], [0, 0, 1, 1], [], []>} : vector<16x3xbf16>, vector<3x128xbf16>, vector<16x128xf32> -> vector<16x128xf32>
    %c0_3 = arith.constant 0 : index
    %c0_4 = arith.constant 0 : index
    %3 = vector.load %arg3[%c0_3, %c0_4] : memref<16x1xf32, #tpu.memory_space<vmem>>, vector<16x1xf32>
    %4 = vector.broadcast %3 : vector<16x1xf32> to vector<16x128xf32>
    %5 = arith.addf %2, %4 : vector<16x128xf32>
    %cst_5 = arith.constant 0.000000e+00 : f32
    %6 = vector.broadcast %cst_5 : f32 to vector<16x128xf32>
    %7 = arith.maximumf %5, %6 : vector<16x128xf32>
    %c0_6 = arith.constant 0 : index
    %c0_7 = arith.constant 0 : index
    %8 = vector.load %arg4[%c0_6, %c0_7] : memref<1x16xf32, #tpu.memory_space<vmem>>, vector<1x16xf32>
    %cst_8 = arith.constant dense<0.000000e+00> : vector<1x128xf32>
    %9 = tpu.matmul %8, %7, %cst_8 {dimension_numbers = #tpu.dot_dimension_numbers<[1], [0], [0], [1], [0, 0, 1, 1], [], []>} : vector<1x16xf32>, vector<16x128xf32>, vector<1x128xf32> -> vector<1x128xf32>
    %c0_9 = arith.constant 0 : index
    %10 = memref.load %arg5[%c0_9] : memref<2xf32, #tpu.memory_space<smem>>
    %c1 = arith.constant 1 : index
    %11 = memref.load %arg5[%c1] : memref<2xf32, #tpu.memory_space<smem>>
    %12 = vector.broadcast %10 : f32 to vector<1x128xf32>
    %13 = arith.cmpf ogt, %9, %12 : vector<1x128xf32>
    %14 = vector.broadcast %11 : f32 to vector<1x128xf32>
    %15 = arith.cmpf olt, %9, %14 : vector<1x128xf32>
    %cst_10 = arith.constant -1.000000e+00 : f32
    %cst_11 = arith.constant 0.000000e+00 : f32
    %16 = vector.broadcast %cst_10 : f32 to vector<1x128xf32>
    %17 = vector.broadcast %cst_11 : f32 to vector<1x128xf32>
    %18 = arith.select %15, %16, %17 : vector<1x128xi1>, vector<1x128xf32>
    %cst_12 = arith.constant 1.000000e+00 : f32
    %19 = vector.broadcast %cst_12 : f32 to vector<1x128xf32>
    %20 = arith.select %13, %19, %18 : vector<1x128xi1>, vector<1x128xf32>
    %21 = arith.truncf %20 : vector<1x128xf32> to vector<1x128xbf16>
    %c0_13 = arith.constant 0 : index
    %c0_14 = arith.constant 0 : index
    %22 = vector.load %arg6[%c0_13, %c0_14] : memref<1x128xbf16, #tpu.memory_space<vmem>>, vector<1x128xbf16>
    tpu.vector_store %arg6[%c0_13, %c0_14], %21 {strides = array<i32>} : memref<1x128xbf16, #tpu.memory_space<vmem>>, vector<1x128xbf16>,
    return
  }
  func.func @transform_0(%arg0: i32) -> (i32, i32) {
    %c0_i32 = arith.constant 0 : i32
    %c0_i32_0 = arith.constant 0 : i32
    return %c0_i32, %arg0 : i32, i32
  }
  func.func @transform_1(%arg0: i32) -> (i32, i32) {
    %c0_i32 = arith.constant 0 : i32
    %c0_i32_0 = arith.constant 0 : i32
    %c0_i32_1 = arith.constant 0 : i32
    return %c0_i32, %c0_i32_0 : i32, i32
  }
  func.func @transform_2(%arg0: i32) -> (i32, i32) {
    %c0_i32 = arith.constant 0 : i32
    %c0_i32_0 = arith.constant 0 : i32
    %c0_i32_1 = arith.constant 0 : i32
    return %c0_i32, %c0_i32_0 : i32, i32
  }
  func.func @transform_3(%arg0: i32) -> (i32, i32) {
    %c0_i32 = arith.constant 0 : i32
    %c0_i32_0 = arith.constant 0 : i32
    %c0_i32_1 = arith.constant 0 : i32
    return %c0_i32, %c0_i32_0 : i32, i32
  }
  func.func @transform_4(%arg0: i32) -> i32 {
    %c0_i32 = arith.constant 0 : i32
    %c0_i32_0 = arith.constant 0 : i32
    return %c0_i32 : i32
  }
  func.func @transform_5(%arg0: i32) -> (i32, i32) {
    %c0_i32 = arith.constant 0 : i32
    %c0_i32_0 = arith.constant 0 : i32
    return %c0_i32, %arg0 : i32, i32
  }
}

</mosaic_0001>

<bundles_post_ra>
// kernel: tpu_custom_call.1
= control target key start
LH: loop header
LB: loop body
LE: loop exit
PB: predicated region body
PF: predicated region fallthrough
CT: control target
= control target key end

     0   :  { %10 = vsyncpa [#allocation4], 0  ;;  %s692_s0 = inlined_call_operand.vmem [shape: bf16[3,256], index: 0, kind: input, shape index: {}]   ;;  %s693_s1 = inlined_call_operand.vmem [shape: bf16[16,3], index: 1, kind: input, shape index: {}]   ;;  %s694_s2 = inlined_call_operand.vmem [shape: f32[16,1], index: 2, kind: input, shape index: {}]   ;;  %s695_s3 = inlined_call_operand.vmem [shape: f32[1,16], index: 3, kind: input, shape index: {}]   ;;  %s696_s4 = inlined_call_operand.vmem [shape: f32[2], index: 4, kind: input, shape index: {}]   ;;  %s697_s5 = inlined_call_operand.hbm [shape: bf16[1,256], index: 5, kind: output, shape index: {}]  }
   0x1   :  { %11 = vsyncpa [#allocation3], 0 }
   0x2   :  { %13 = vsyncpa [#allocation3 + $0x1], 0  ;;  %s589_s18 = smov 0   ;;  %s591_s19 = smov 0  }
   0x3   :  { %s593_s20 = smov 0   ;;  %s595_s21 = smov 0  }
   0x4 LB: > { %s610_s22 = sadd.s32 4294967295, %s553_s21   ;;  %s401_s23 = sadd.s32 4294967294, %s553_s21   ;;  %s553_s21 = sphi %s595_s21, %s703_s21   ;;  %s549_s20 = sphi %s593_s20, %s702_s20   ;;  %s545_s19 = sphi %s591_s19, %s701_s19   ;;  %s541_s18 = sphi %s589_s18, %s700_s18  }
   0x5   : > { %s614_s24 = sadd.s32 1, %s553_s21   ;;  %s136_s25 = sadd.s32 1, %s549_s20 }
   0x6   : > { %s133_s26 = ssub.s32 %s553_s21, %s614_s24  ;;  %p146_p0 = scmp.ne.s32.totalorder %s549_s20, %s545_s19 }
   0x7   : > { %p134_p1 = scmp.eq.s32.totalorder %s133_s26, 0  ;;  %p147_p2 = scmp.eq.s32.totalorder %s610_s22, 1 }
   0x8   : > { %p152_p3 = scmp.ne.s32.totalorder %s545_s19, %s541_s18  ;;  %p153_p4 = scmp.eq.s32.totalorder %s401_s23, 1 }
   0x9   : > { %s625_s27 = scalar_select %p134_p1, %s549_s20, %s136_s25  }
   0xa   : > { %p627_p5 = por %p147_p2, %p146_p0  ;;  %p631_p6 = por %p153_p4, %p152_p3 }
   0xb   : > { %p402_p7 = scmp.ge.s32.totalorder %s553_s21, 1  ;;  %p160_p8 = scmp.lt.s32.totalorder %s553_s21, 3 }
   0xc   : > { %p432_p9 = scmp.eq.s32.totalorder %s610_s22, 0  ;;  %s181_s7 = sshll.u32 %s696_s4, 4  ;;  %s182_s7 = int_to_ptr.vmem [resolvable:$true] %s181_s7 }
   0xd   : > { %p161_p10 = pnand %p402_p7, %p160_p8  ;;  %s555_s8 = smov [#allocation2]  }
   0xf   : > { %p424_p11 = pneg %p161_p10  ;;  %201 = sbr.rel (%p161_p10) target bundleno = 311 (0x137), region = 40 }
  0x11   : > { %p425_p12 = pnand %p432_p9, %p424_p11 }
  0x13   : > { %427 = dma.vmem_to_smem (!%p425_p12), %s182_s7, 16, %s555_s8, [#allocation4]  }
  0x14   : > { %532 = dma.done.wait (%p432_p9), [#allocation4], 16  }
  0x15   : > { %534 = vsyncadd (%p432_p9), [#allocation4], 4294967280 }
  0x16   : > { %208 = sfence }
  0x17   : > { %p229_p13 = scmp.lt.s32.totalorder %s610_s22, 1  ;;  %vm258_vm0 = vcmask 1040384   ;;  %vm259_vm1 = vcmask 1041408   ;;  %v556_v0 = vmov 65535   ;;  %v238_v2 = vld [vmem:[%s694_s2 + $0x8] sm:$0xff]  ;;  %v557_v3 = vmov 0  }
  0x18   : > { %v260_v1 = vsel %vm258_vm0, 4294967295, %v556_v0  ;;  %471 = vset.pattern.permute.xlu0 %v557_v3  ;;  %v417_v7 = vld [vmem:[%s693_s1] sm:$0xff]  ;;  %vm254_vm2 = vcmask 23552   ;;  %vm282_vm3 = vcmask 130048   ;;  %s306_s6 = sld [smem:[#allocation2]]  ;;  %s227_s8 = sand.u32 1, %s545_s19  }
  0x19   : > { %s230_s11 = scalar_select %p229_p13, %s610_s22, 1  ;;  %246 = vperm.xlu0 %471, %v238_v2   ;;  %v261_v4 = vsel %vm259_vm1, %v260_v1, 0  ;;  %v237_v8 = vld [vmem:[%s694_s2] sm:$0xff]  ;;  %vm316_vm4 = vsmask.f32 256  ;;  %v558_v21 = vmov 0.0  }
  0x1a   : > { %v281_v17 = vld [vmem:[%s695_s3] sm:$0x1]  ;;  %s414_s7 = sld [smem:[#allocation2 + $0x1]]  ;;  %vm317_vm7 = vmand %vm258_vm0, %vm316_vm4  ;;  %s507_s25 = scalar_lea.hbm %s697_s5, 2 }
  0x1b   : > { %s407_s12 = sshll.u32 %s230_s11, 1  ;;  %s330_s11 = scalar_lea.hbm %s697_s5, %s610_s22 }
  0x1c   : > { %s232_s15 = scalar_lea.vmem %s692_s0, %s407_s12  ;;  %s228_s12 = scalar_lea.vmem [#allocation5], %s227_s8 }
  0x1d   : > { %v236_v5 = vld [vmem:[%s232_s15] sm:$0x3]  ;;  %s332_s13 = sshll.u32 %s228_s12, 4  ;;  %s334_s14 = sshll.u32 %s330_s11, 4  ;;  %s333_s13 = int_to_ptr.vmem [resolvable:$true] %s332_s13  ;;  %s335_s14 = int_to_ptr.hbm [resolvable:$true] %s334_s14 }
  0x1e   : > { %v263_v6 = vand.u32 %v261_v4, %v236_v5  ;;  %v308_v18 = vstv %s306_s6  ;;  %v318_v24 = vld [vmem:[%s228_s12] sm:$0x1]  ;;  %s322_s22 = scalar_lea.sflag [#allocation3], %s227_s8  ;;  %s501_s15 = sshra.s32 %s335_s14, 4  ;;  %s502_s15 = int_to_ptr.hbm [resolvable:$true] %s501_s15 }
  0x1f   : > { %s503_s16 = scalar_lea.hbm %s502_s15, 1  ;;  %p508_p3 = scmp.lt.s32.totalorder %s502_s15, %s697_s5 }
  0x20   : > { %272 = vmatpush.bf16.msra.mxu0 %v263_v6  ;;  %v310_v19 = vstv %s414_s7  ;;  %p504_p0 = scmp.ne.s32.totalorder %s502_s15, %s503_s16  ;;  %p509_p4 = scmp.lt.s32.totalorder %s507_s25, %s503_s16 }
  0x21   : > { %241 = vperm.xlu0 %471, %v237_v8  }
  0x22   : > { %p505_p1 = pnand %p504_p0, %p627_p5  ;;  %p510_p7 = por %p509_p4, %p508_p3 }
  0x23   : > { %412 = vmatmul.msk.bf16.vlgmr.msra.gmra.mxu0 %vm254_vm2, %v417_v7 }
  0x24   : > { %p506_p2 = pneg %p505_p1 }
  0x26   : > { %p511_p8 = pnand %p510_p7, %p506_p2 }
  0x8b   : > { %v247_v9 = vpop.permute.xlu0 %246 }
  0x93   : > { %v242_v11 = vpop.permute.xlu0 %241 }
  0xa0   : > { %v274_v10 = vpop.f32.mrf.mxu0 }
  0xa1   : > { %v275_v13 = vadd.f32 %v274_v10, %v242_v11 }
  0xa3   : > { %v279_v16 = vmax.f32 %v275_v13, 0.0 }
  0xa8   : > { %v276_v12 = vpop.f32.mrf.mxu0 }
  0xa9   : > { %v277_v14 = vadd.f32 %v276_v12, %v247_v9 }
  0xab   : > { %v280_v15 = vmax.f32 %v277_v14, 0.0 }
  0xad   : > { %300 = vmatpush.msra.mxu1 %v280_v15 }
  0xaf   : > { %301 = vmatpush.msra.mxu1 %v279_v16 }
  0xb0   : > { %413 = vmatmul.msk.f32.vlgmr.msra.gmra.mxu1 %vm282_vm3, %v281_v17 }
 0x12d   : > { %v303_v20 = vpop.f32.mrf.mxu1 }
 0x12e   : > { %vm309_vm5 = vcmp.gt.f32.partialorder %v303_v20, %v308_v18  ;;  %vm311_vm6 = vcmp.lt.f32.partialorder %v303_v20, %v310_v19 }
 0x12f   : > { %v312_v22 = vsel %vm311_vm6, -1.0, %v558_v21 }
 0x130   : > { %v313_v23 = vsel %vm309_vm5, 1.0, %v312_v22 }
 0x131   : > { %v314_v25 = vpack.c.bf16 %v313_v23, %v313_v23 }
 0x133   : > { %v319_v26 = vsel %vm317_vm7, %v314_v25, %v318_v24 }
 0x134   : > { %320 = vst [vmem:[%s228_s12] sm:$0x1] %v319_v26 }
 0x135   : > { %514 = shalt.err (!%p511_p8)
}
 0x136   : > { %422 = dma.vmem_to_hbm [thread:$0]  (%p627_p5), %s333_s13, 16, %s335_s14, %s322_s22  }
 0x137 PF: > { %p434_p9 = scmp.ge.s32.totalorder %s553_s21, 2  ;;  %s346_s6 = sand.u32 1, %s541_s18  }
 0x138   : > { %s347_s7 = scalar_lea.sflag [#allocation3], %s346_s6 }
 0x139   : > { %p429_p10 = pnand %p434_p9, %p631_p6 }
 0x13b   : > { %p430_p11 = pneg %p429_p10 }
 0x13d   : > { %536 = dma.done.wait (%p430_p11), %s347_s7, 16  }
 0x13e   : > { %538 = vsyncadd (%p430_p11), %s347_s7, 4294967280  ;;  %p16_p12 = scmp.ge.s32.totalorder %s614_s24, 4   ;;  %s700_s18 = smov %s545_s19 }
 0x13f   : > { %s701_s19 = smov %s549_s20  ;;  %s702_s20 = smov %s625_s27 }
 0x140   : > { %s703_s21 = smov %s614_s24  ;;  %18 = sbr.rel (!%p16_p12) target bundleno = 4 (0x4), region = 80 }
 0x145   :  { %352 = vsyncpa [#allocation3], 1 }
 0x146   :  { %354 = vsyncpa [#allocation3 + $0x1], 1 }
 0x147   :  { %355 = vsyncpa [#allocation4], 1 }
 0x148   :  { %357 = vsyncpa [#allocation4 + $0x1], 1 }

</bundles_post_ra>
